<compile_context>
chip_gen: v7x
topology: tpu7x:2x2x1
jax: 0.10.0
libtpu: 0.0.40
codegen_flags: <defaults>
</compile_context>

<pallas_src>
import math
import jax
import jax.numpy as jnp
from jax.experimental import pallas as pl
from jax.experimental.pallas import tpu as pltpu


# ----------------------------------------------------------------------------
# Kernels
# ----------------------------------------------------------------------------
def _fused_cat_kernel(xc_ref, w_ref, pe_ref, out_ref):
    """Multi-seq-tile path: one MXU matmul per (batch-block, seq-tile).

    xc_ref : (Bb, TL, K)       fused input  [conv tap0 | tap1 | tap2 | time feats]
    w_ref  : (K, d_model)      fused weight (3 conv taps stacked + linear weight)
    pe_ref : (TL, d_model)     positional encoding with conv/linear biases folded in (f32)
    out_ref: (Bb, TL, d_model)
    """
    acc = jnp.einsum('btk,kd->btd', xc_ref[...], w_ref[...],
                     preferred_element_type=jnp.float32)
    out_ref[...] = (acc + pe_ref[...]).astype(out_ref.dtype)


def _roll_kernel(x_ref, xm_ref, wc_ref, wl_ref, pe_ref, out_ref):
    """Single-seq-tile path: circular conv taps built in-kernel via pltpu.roll
    (circular padding == roll when the tile covers the whole sequence), so the
    fused x_cat never round-trips through HBM.

    x_ref  : (Bb, L, d_in)
    xm_ref : (Bb, L, d_mark)
    wc_ref : (3, d_in, d_model)   conv taps, transposed to (Cin, Cout)
    wl_ref : (d_mark, d_model)
    pe_ref : (L, d_model)         positional encoding + biases (f32)
    out_ref: (Bb, L, d_model)
    """
    x = x_ref[...]
    L = x.shape[1]
    x_prev = pltpu.roll(x, 1, 1)        # x[t-1] (circular)
    x_next = pltpu.roll(x, L - 1, 1)    # x[t+1] (circular)
    acc = jnp.einsum('btk,kd->btd', x_prev, wc_ref[0],
                     preferred_element_type=jnp.float32)
    acc += jnp.einsum('btk,kd->btd', x, wc_ref[1],
                      preferred_element_type=jnp.float32)
    acc += jnp.einsum('btk,kd->btd', x_next, wc_ref[2],
                      preferred_element_type=jnp.float32)
    acc += jnp.einsum('btm,md->btd', xm_ref[...], wl_ref[...],
                      preferred_element_type=jnp.float32)
    out_ref[...] = (acc + pe_ref[...]).astype(out_ref.dtype)


# ----------------------------------------------------------------------------
# Helpers
# ----------------------------------------------------------------------------
def _positional_encoding(L, d_model):
    """pe[:, 0::2] = sin, pe[:, 1::2] = cos — built by interleave stack+reshape
    (no strided scatters)."""
    position = jnp.arange(L, dtype=jnp.float32)[:, None]
    div_term = jnp.exp(jnp.arange(0, d_model, 2, dtype=jnp.float32)
                       * (-math.log(10000.0) / d_model))
    ang = position * div_term                                  # (L, d_model//2)
    return jnp.stack([jnp.sin(ang), jnp.cos(ang)], axis=-1).reshape(L, d_model)


def _per_step_vmem(bb, tl, k_stream, d_model, in_bytes, out_bytes):
    """Double-buffered per-grid-step VMEM working set (bytes)."""
    xc = bb * tl * k_stream * in_bytes
    w = k_stream * d_model * in_bytes
    pe = tl * d_model * 4
    out = bb * tl * d_model * out_bytes
    return 2 * (xc + w + pe + out)


def _vmem_limit(per_step):
    # right-sized for v7x's 64 MiB physical VMEM; headroom but no 48 MiB ask
    return int(min(40 << 20, max(8 << 20, per_step + (4 << 20))))


def _pick_batch_block(B, num_lt, tl, k_stream, d_model, in_bytes, out_bytes,
                      *, max_bb=8, vmem_budget=20 << 20):
    """Largest divisor of B (<= max_bb) whose double-buffered tile fits the VMEM
    budget, while keeping >= 2 total grid steps for v7x megacore when possible."""
    divs = [d for d in range(min(max_bb, B), 0, -1) if B % d == 0]
    divs = [d for d in divs
            if _per_step_vmem(d, tl, k_stream, d_model, in_bytes, out_bytes)
            <= vmem_budget] or [1]
    for d in divs:
        if num_lt * (B // d) >= 2:
            return d
    return divs[-1]


# ----------------------------------------------------------------------------
# Wrapper
# ----------------------------------------------------------------------------
def data_embedding(x, x_mark, conv_w, conv_b, lin_w, lin_b,
                   *, row_tile=512,
                   input_dtype=jnp.bfloat16,
                   out_dtype=jnp.bfloat16):
    """DataEmbedding forward (eval mode).

    x:      (B, L, d_input)      x_mark: (B, L, d_mark)
    conv_w: (d_model, d_input, 3) conv_b: (d_model,)
    lin_w:  (d_model, d_mark)     lin_b:  (d_model,)
    returns (B, L, d_model) in out_dtype.
    """
    B, L, d_input = x.shape
    d_model = conv_w.shape[0]
    d_mark = x_mark.shape[-1]
    assert d_model % 2 == 0, "PositionalEmbedding requires even d_model"
    row_tile = max(8, (row_tile // 8) * 8)

    in_bytes = jnp.dtype(input_dtype).itemsize
    out_bytes = jnp.dtype(out_dtype).itemsize

    # Positional encoding with both per-channel biases folded in (kept f32).
    # NOTE: folding is valid only because conv_b / lin_b are purely per-channel
    # additive (they are, for nn.Conv1d / nn.Linear biases).
    pe_plus = (_positional_encoding(L, d_model)
               + conv_b[None, :] + lin_b[None, :]).astype(jnp.float32)

    # Conv tap k transposed to (Cin, Cout):  out[t] = sum_k x_pad[t+k] @ wc[k]
    wc = jnp.transpose(conv_w, (2, 1, 0))                      # (3, d_input, d_model)

    # ---------------------- single-seq-tile roll path -----------------------
    if L <= row_tile and L % 8 == 0:
        k_stream = d_input + d_mark
        bb = _pick_batch_block(B, 1, L, k_stream, d_model, in_bytes, out_bytes)
        num_b = B // bb
        per_step = _per_step_vmem(bb, L, k_stream, d_model, in_bytes, out_bytes)

        grid_spec = pltpu.PrefetchScalarGridSpec(
            num_scalar_prefetch=0,
            grid=(num_b,),
            in_specs=[
                pl.BlockSpec((bb, L, d_input), lambda b: (b, 0, 0)),
                pl.BlockSpec((bb, L, d_mark), lambda b: (b, 0, 0)),
                pl.BlockSpec((3, d_input, d_model), lambda b: (0, 0, 0)),
                pl.BlockSpec((d_mark, d_model), lambda b: (0, 0)),
                pl.BlockSpec((L, d_model), lambda b: (0, 0)),
            ],
            out_specs=pl.BlockSpec((bb, L, d_model), lambda b: (b, 0, 0)),
        )
        # TODO(synk): nn.Dropout(p=0.1) is identity in eval mode; not applied.
        return pl.pallas_call(
            _roll_kernel,
            out_shape=jax.ShapeDtypeStruct((B, L, d_model), out_dtype),
            grid_spec=grid_spec,
            compiler_params=pltpu.CompilerParams(
                dimension_semantics=("parallel",),
                vmem_limit_bytes=_vmem_limit(per_step)),
        )(x.astype(input_dtype), x_mark.astype(input_dtype),
          wc.astype(input_dtype), lin_w.T.astype(input_dtype), pe_plus)

    # ---------------------- multi-seq-tile fused path -----------------------
    # Conv1d(kernel=3, padding=1, padding_mode='circular') on the seq axis:
    #   out[t] = sum_k x_pad[t + k] @ wc[k],   x_pad = [x[L-1], x, x[0]]
    x_pad = jnp.concatenate([x[:, -1:, :], x, x[:, :1, :]], axis=1)   # (B, L+2, d_in)
    x_cat = jnp.concatenate(
        [x_pad[:, 0:L, :],       # tap 0
         x,                      # tap 1
         x_pad[:, 2:L + 2, :],   # tap 2
         x_mark],                # time features
        axis=-1).astype(input_dtype)                                   # (B, L, K)
    K = 3 * d_input + d_mark
    w_cat = jnp.concatenate([wc.reshape(3 * d_input, d_model), lin_w.T],
                            axis=0).astype(input_dtype)                # (K, d_model)

    # Seq tile: largest multiple-of-8 divisor of L up to row_tile (no partial
    # last tile -> unmasked lane-dense stores). Fallback: row_tile with a
    # (correct, slightly slower) partial last tile handled by Pallas.
    TL = None
    for t in range(min(row_tile, (L // 8) * 8), 7, -8):
        if L % t == 0:
            TL = t
            break
    if TL is None:
        TL = min(row_tile, L)
    num_lt = pl.cdiv(L, TL)

    bb = _pick_batch_block(B, num_lt, TL, K, d_model, in_bytes, out_bytes)
    num_b = B // bb
    per_step = _per_step_vmem(bb, TL, K, d_model, in_bytes, out_bytes)

    grid_spec = pltpu.PrefetchScalarGridSpec(
        num_scalar_prefetch=0,
        grid=(num_lt, num_b),            # lt outer -> pe tile resident over batch
        in_specs=[
            pl.BlockSpec((bb, TL, K), lambda lt, b: (b, lt, 0)),
            pl.BlockSpec((K, d_model), lambda lt, b: (0, 0)),
            pl.BlockSpec((TL, d_model), lambda lt, b: (lt, 0)),
        ],
        out_specs=pl.BlockSpec((bb, TL, d_model), lambda lt, b: (b, lt, 0)),
    )
    # TODO(synk): nn.Dropout(p=0.1) is identity in eval mode; not applied.
    return pl.pallas_call(
        _fused_cat_kernel,
        out_shape=jax.ShapeDtypeStruct((B, L, d_model), out_dtype),
        grid_spec=grid_spec,
        compiler_params=pltpu.CompilerParams(
            dimension_semantics=("parallel", "parallel"),
            vmem_limit_bytes=_vmem_limit(per_step)),
    )(x_cat, w_cat, pe_plus)


# ----------------------------------------------------------------------------
# Pure-JAX reference (unfused) for correctness checks
# ----------------------------------------------------------------------------
def _reference(x, x_mark, conv_w, conv_b, lin_w, lin_b):
    B, L, d_input = x.shape
    d_model = conv_w.shape[0]
    x_pad = jnp.concatenate([x[:, -1:, :], x, x[:, :1, :]], axis=1)
    tok = conv_b[None, None, :]
    for k in range(3):
        tok = tok + jnp.einsum('blc,cd->bld', x_pad[:, k:k + L, :],
                               conv_w[:, :, k].T,
                               precision=jax.lax.Precision.HIGHEST)
    tim = jnp.einsum('blm,md->bld', x_mark, lin_w.T,
                     precision=jax.lax.Precision.HIGHEST) + lin_b[None, None, :]
    pe = _positional_encoding(L, d_model)
    return tok + tim + pe[None, :, :]


if __name__ == "__main__":
    keys = jax.random.split(jax.random.PRNGKey(0), 6)

    def make_params(key, d_input, d_mark, d_model):
        k3, k4, k5, k6 = jax.random.split(key, 4)
        fan_in = d_input * 3
        conv_w = jax.random.normal(k3, (d_model, d_input, 3), jnp.float32) * math.sqrt(2.0 / fan_in)
        conv_b = jax.random.normal(k4, (d_model,), jnp.float32) * 0.01
        lin_w = jax.random.normal(k5, (d_model, d_mark), jnp.float32) * math.sqrt(1.0 / d_mark)
        lin_b = jax.random.normal(k6, (d_model,), jnp.float32) * 0.01
        return conv_w, conv_b, lin_w, lin_b

    # ---- test 1: small shapes, single-seq-tile roll path ----
    B, L, d_input, d_mark, d_model = 2, 8, 4, 4, 32
    x = jax.random.normal(keys[0], (B, L, d_input), jnp.float32)
    x_mark = jax.random.normal(keys[1], (B, L, d_mark), jnp.float32)
    conv_w, conv_b, lin_w, lin_b = make_params(keys[2], d_input, d_mark, d_model)
    ref = _reference(x, x_mark, conv_w, conv_b, lin_w, lin_b)

    out_f32 = data_embedding(x, x_mark, conv_w, conv_b, lin_w, lin_b,
                             input_dtype=jnp.float32, out_dtype=jnp.float32)
    jax.block_until_ready(out_f32)
    assert out_f32.shape == (B, L, d_model)
    assert jnp.allclose(out_f32, ref, atol=1e-2, rtol=1e-2), "f32 roll-path mismatch"

    out_bf16 = data_embedding(x, x_mark, conv_w, conv_b, lin_w, lin_b)  # bf16 defaults
    jax.block_until_ready(out_bf16)
    assert out_bf16.dtype == jnp.bfloat16
    assert jnp.allclose(out_bf16.astype(jnp.float32), ref, atol=1e-1, rtol=1e-1), \
        "bf16 roll-path mismatch"

    # ---- test 2: multi-seq-tile fused path (lane-dense d_model, batch block) ----
    B2, L2, di2, dm2, D2 = 4, 192, 7, 5, 128
    x2 = jax.random.normal(keys[3], (B2, L2, di2), jnp.float32)
    xm2 = jax.random.normal(keys[4], (B2, L2, dm2), jnp.float32)
    cw2, cb2, lw2, lb2 = make_params(keys[5], di2, dm2, D2)
    ref2 = _reference(x2, xm2, cw2, cb2, lw2, lb2)
    out2 = data_embedding(x2, xm2, cw2, cb2, lw2, lb2, row_tile=64,
                          input_dtype=jnp.float32, out_dtype=jnp.float32)
    jax.block_until_ready(out2)
    assert out2.shape == (B2, L2, D2)
    assert jnp.allclose(out2, ref2, atol=1e-2, rtol=1e-2), "tiled-path mismatch"

    print("KERNEL_OK")
</pallas_src>

<mosaic_0001>
module attributes {stable_mosaic.version = 11 : i64} {
  func.func @_roll_kernel(%arg0: i32, %arg1: memref<1x8x4xf32, #tpu.memory_space<vmem>>, %arg2: memref<1x8x4xf32, #tpu.memory_space<vmem>>, %arg3: memref<3x4x32xf32, #tpu.memory_space<vmem>>, %arg4: memref<4x32xf32, #tpu.memory_space<vmem>>, %arg5: memref<8x32xf32, #tpu.memory_space<vmem>>, %arg6: memref<1x8x32xf32, #tpu.memory_space<vmem>>) attributes {dimension_semantics = [#tpu.dimension_semantics<parallel>], iteration_bounds = array<i64: 2>, scalar_prefetch = 0 : i64, scratch_operands = 0 : i64, tpu.core_type = #tpu.core_type<tc>, window_params = [{transform_indices = @transform_0, window_bounds = array<i64: 1, 8, 4>}, {transform_indices = @transform_1, window_bounds = array<i64: 1, 8, 4>}, {pipeline_mode = #tpu.pipeline_mode<synchronous>, transform_indices = @transform_2, window_bounds = array<i64: 3, 4, 32>}, {pipeline_mode = #tpu.pipeline_mode<synchronous>, transform_indices = @transform_3, window_bounds = array<i64: 4, 32>}, {pipeline_mode = #tpu.pipeline_mode<synchronous>, transform_indices = @transform_4, window_bounds = array<i64: 8, 32>}, {transform_indices = @transform_5, window_bounds = array<i64: 1, 8, 32>}]} {
    %c0 = arith.constant 0 : index
    %c0_0 = arith.constant 0 : index
    %c0_1 = arith.constant 0 : index
    %0 = vector.load %arg1[%c0, %c0_0, %c0_1] : memref<1x8x4xf32, #tpu.memory_space<vmem>>, vector<1x8x4xf32>
    %c1_i32 = arith.constant 1 : i32
    %1 = tpu.dynamic_rotate %0 by %c1_i32 dim 1 : vector<1x8x4xf32>, i32 -> vector<1x8x4xf32>
    %c7_i32 = arith.constant 7 : i32
    %2 = tpu.dynamic_rotate %0 by %c7_i32 dim 1 : vector<1x8x4xf32>, i32 -> vector<1x8x4xf32>
    %c0_2 = arith.constant 0 : index
    %c0_3 = arith.constant 0 : index
    %c0_4 = arith.constant 0 : index
    %3 = vector.load %arg3[%c0_2, %c0_3, %c0_4] : memref<3x4x32xf32, #tpu.memory_space<vmem>>, vector<1x4x32xf32>
    %4 = vector.shape_cast %3 : vector<1x4x32xf32> to vector<4x32xf32>
    "tpu.trace_start"() <{level = 10 : i32, message = "btk,kd->btd"}> : () -> ()
    %cst = arith.constant dense<0.000000e+00> : vector<1x8x32xf32>
    %5 = tpu.matmul %1, %4, %cst {dimension_numbers = #tpu.dot_dimension_numbers<[2], [0], [0, 1], [1], [0, 0, 0, 1, 1, 1], [], []>} : vector<1x8x4xf32>, vector<4x32xf32>, vector<1x8x32xf32> -> vector<1x8x32xf32>
    "tpu.trace_stop"() : () -> ()
    %c1 = arith.constant 1 : index
    %c0_5 = arith.constant 0 : index
    %c0_6 = arith.constant 0 : index
    %6 = vector.load %arg3[%c1, %c0_5, %c0_6] : memref<3x4x32xf32, #tpu.memory_space<vmem>>, vector<1x4x32xf32>
    %7 = vector.shape_cast %6 : vector<1x4x32xf32> to vector<4x32xf32>
    "tpu.trace_start"() <{level = 10 : i32, message = "btk,kd->btd"}> : () -> ()
    %cst_7 = arith.constant dense<0.000000e+00> : vector<1x8x32xf32>
    %8 = tpu.matmul %0, %7, %cst_7 {dimension_numbers = #tpu.dot_dimension_numbers<[2], [0], [0, 1], [1], [0, 0, 0, 1, 1, 1], [], []>} : vector<1x8x4xf32>, vector<4x32xf32>, vector<1x8x32xf32> -> vector<1x8x32xf32>
    "tpu.trace_stop"() : () -> ()
    %9 = arith.addf %5, %8 : vector<1x8x32xf32>
    %c2 = arith.constant 2 : index
    %c0_8 = arith.constant 0 : index
    %c0_9 = arith.constant 0 : index
    %10 = vector.load %arg3[%c2, %c0_8, %c0_9] : memref<3x4x32xf32, #tpu.memory_space<vmem>>, vector<1x4x32xf32>
    %11 = vector.shape_cast %10 : vector<1x4x32xf32> to vector<4x32xf32>
    "tpu.trace_start"() <{level = 10 : i32, message = "btk,kd->btd"}> : () -> ()
    %cst_10 = arith.constant dense<0.000000e+00> : vector<1x8x32xf32>
    %12 = tpu.matmul %2, %11, %cst_10 {dimension_numbers = #tpu.dot_dimension_numbers<[2], [0], [0, 1], [1], [0, 0, 0, 1, 1, 1], [], []>} : vector<1x8x4xf32>, vector<4x32xf32>, vector<1x8x32xf32> -> vector<1x8x32xf32>
    "tpu.trace_stop"() : () -> ()
    %13 = arith.addf %9, %12 : vector<1x8x32xf32>
    %c0_11 = arith.constant 0 : index
    %c0_12 = arith.constant 0 : index
    %c0_13 = arith.constant 0 : index
    %14 = vector.load %arg2[%c0_11, %c0_12, %c0_13] : memref<1x8x4xf32, #tpu.memory_space<vmem>>, vector<1x8x4xf32>
    %c0_14 = arith.constant 0 : index
    %c0_15 = arith.constant 0 : index
    %15 = vector.load %arg4[%c0_14, %c0_15] : memref<4x32xf32, #tpu.memory_space<vmem>>, vector<4x32xf32>
    "tpu.trace_start"() <{level = 10 : i32, message = "btm,md->btd"}> : () -> ()
    %cst_16 = arith.constant dense<0.000000e+00> : vector<1x8x32xf32>
    %16 = tpu.matmul %14, %15, %cst_16 {dimension_numbers = #tpu.dot_dimension_numbers<[2], [0], [0, 1], [1], [0, 0, 0, 1, 1, 1], [], []>} : vector<1x8x4xf32>, vector<4x32xf32>, vector<1x8x32xf32> -> vector<1x8x32xf32>
    "tpu.trace_stop"() : () -> ()
    %17 = arith.addf %13, %16 : vector<1x8x32xf32>
    %c0_17 = arith.constant 0 : index
    %c0_18 = arith.constant 0 : index
    %18 = vector.load %arg5[%c0_17, %c0_18] : memref<8x32xf32, #tpu.memory_space<vmem>>, vector<8x32xf32>
    %19 = vector.shape_cast %18 : vector<8x32xf32> to vector<1x8x32xf32>
    %20 = arith.addf %17, %19 : vector<1x8x32xf32>
    %c0_19 = arith.constant 0 : index
    %c0_20 = arith.constant 0 : index
    %c0_21 = arith.constant 0 : index
    %21 = vector.load %arg6[%c0_19, %c0_20, %c0_21] : memref<1x8x32xf32, #tpu.memory_space<vmem>>, vector<1x8x32xf32>
    tpu.vector_store %arg6[%c0_19, %c0_20, %c0_21], %20 {strides = array<i32>} : memref<1x8x32xf32, #tpu.memory_space<vmem>>, vector<1x8x32xf32>,
    return
  }
  func.func @transform_0(%arg0: i32) -> (i32, i32, i32) {
    %c0_i32 = arith.constant 0 : i32
    %c0_i32_0 = arith.constant 0 : i32
    %c0_i32_1 = arith.constant 0 : i32
    return %arg0, %c0_i32, %c0_i32_0 : i32, i32, i32
  }
  func.func @transform_1(%arg0: i32) -> (i32, i32, i32) {
    %c0_i32 = arith.constant 0 : i32
    %c0_i32_0 = arith.constant 0 : i32
    %c0_i32_1 = arith.constant 0 : i32
    return %arg0, %c0_i32, %c0_i32_0 : i32, i32, i32
  }
  func.func @transform_2(%arg0: i32) -> (i32, i32, i32) {
    %c0_i32 = arith.constant 0 : i32
    %c0_i32_0 = arith.constant 0 : i32
    %c0_i32_1 = arith.constant 0 : i32
    %c0_i32_2 = arith.constant 0 : i32
    return %c0_i32, %c0_i32_0, %c0_i32_1 : i32, i32, i32
  }
  func.func @transform_3(%arg0: i32) -> (i32, i32) {
    %c0_i32 = arith.constant 0 : i32
    %c0_i32_0 = arith.constant 0 : i32
    %c0_i32_1 = arith.constant 0 : i32
    return %c0_i32, %c0_i32_0 : i32, i32
  }
  func.func @transform_4(%arg0: i32) -> (i32, i32) {
    %c0_i32 = arith.constant 0 : i32
    %c0_i32_0 = arith.constant 0 : i32
    %c0_i32_1 = arith.constant 0 : i32
    return %c0_i32, %c0_i32_0 : i32, i32
  }
  func.func @transform_5(%arg0: i32) -> (i32, i32, i32) {
    %c0_i32 = arith.constant 0 : i32
    %c0_i32_0 = arith.constant 0 : i32
    %c0_i32_1 = arith.constant 0 : i32
    return %arg0, %c0_i32, %c0_i32_0 : i32, i32, i32
  }
}

</mosaic_0001>

<bundles_post_ra>
// kernel: tpu_custom_call.1
= control target key start
LH: loop header
LB: loop body
LE: loop exit
PB: predicated region body
PF: predicated region fallthrough
CT: control target
= control target key end

     0   :  { %10 = vsyncpa [#allocation3], 0  ;;  %s961_s0 = inlined_call_operand.vmem [shape: f32[2,8,4], index: 0, kind: input, shape index: {}]   ;;  %s962_s1 = inlined_call_operand.vmem [shape: f32[2,8,4], index: 1, kind: input, shape index: {}]   ;;  %s963_s2 = inlined_call_operand.vmem [shape: f32[3,4,32], index: 2, kind: input, shape index: {}]   ;;  %s964_s3 = inlined_call_operand.vmem [shape: f32[4,32], index: 3, kind: input, shape index: {}]   ;;  %s965_s4 = inlined_call_operand.vmem [shape: f32[8,32], index: 4, kind: input, shape index: {}]   ;;  %s966_s5 = inlined_call_operand.hbm [shape: f32[2,8,32], index: 5, kind: output, shape index: {}]  }
   0x1   :  { %12 = vsyncpa [#allocation3 + $0x1], 0  ;;  %s831_s18 = smov 0   ;;  %s833_s19 = smov 0  }
   0x2   :  { %s835_s20 = smov 0   ;;  %s837_s21 = smov 0  }
   0x3 LB: > { %s852_s22 = sadd.s32 4294967295, %s796_s21   ;;  %s644_s23 = sadd.s32 4294967294, %s796_s21   ;;  %s796_s21 = sphi %s837_s21, %s972_s21   ;;  %s792_s20 = sphi %s835_s20, %s971_s20   ;;  %s788_s19 = sphi %s833_s19, %s970_s19   ;;  %s784_s18 = sphi %s831_s18, %s969_s18  }
   0x4   : > { %s856_s24 = sadd.s32 1, %s796_s21   ;;  %s140_s25 = sadd.s32 1, %s792_s20 }
   0x5   : > { %s137_s26 = ssub.s32 %s796_s21, %s856_s24  ;;  %p150_p0 = scmp.ne.s32.totalorder %s792_s20, %s788_s19 }
   0x6   : > { %p138_p1 = scmp.eq.s32.totalorder %s137_s26, 0  ;;  %p151_p2 = scmp.eq.s32.totalorder %s852_s22, 1 }
   0x7   : > { %p156_p3 = scmp.ne.s32.totalorder %s788_s19, %s784_s18  ;;  %p157_p4 = scmp.eq.s32.totalorder %s644_s23, 1 }
   0x8   : > { %s867_s27 = scalar_select %p138_p1, %s792_s20, %s140_s25  }
   0x9   : > { %p869_p5 = por %p151_p2, %p150_p0  ;;  %p873_p6 = por %p157_p4, %p156_p3 }
   0xa   : > { %p647_p7 = scmp.ge.s32.totalorder %s796_s21, 1  ;;  %p198_p8 = scmp.lt.s32.totalorder %s796_s21, 3 }
   0xc   : > { %p199_p9 = pnand %p647_p7, %p198_p8 }
   0xd   : > { %v651_v0 = vld [vmem:[%s963_s2 + $0x4] sm:$0xf] (!%p199_p9)  ;;  %vm247_vm0 = vcmask (!%p199_p9), 1043456   ;;  %p229_p10 = scmp.lt.s32.totalorder (!%p199_p9), %s852_s22, 1  ;;  %v798_v1 = vmov (!%p199_p9), 0.0   ;;  %vm799_vm1 = vmmov (!%p199_p9), 0  }
   0xe   : > { %202 = sbr.rel (%p199_p9) target bundleno = 262 (0x106), region = 40  ;;  %673 = vmatprep.subr.mxu0 (!%p199_p9), %v798_v1  ;;  %675 = vmatprep.mubr.msk.f32.mxu0 (!%p199_p9), %vm799_vm1, %v798_v1  ;;  %v240_v2 = vld [vmem:[%s963_s2] sm:$0xf] (!%p199_p9)  ;;  %vm243_vm2 = vcmask (!%p199_p9), 31744   ;;  %v656_v3 = vld [vmem:[%s963_s2 + $0x8] sm:$0xf] (!%p199_p9) }
   0xf   : > { %674 = vmatpush3.msk.msra.mxu0 (!%p199_p9), %vm247_vm0, %v651_v0  ;;  %678 = vmatprep.subr.mxu1 (!%p199_p9), %v798_v1  ;;  %v477_v7 = vld [vmem:[%s964_s3] sm:$0xf] (!%p199_p9)  ;;  %s226_s30 = sand.u32 (!%p199_p9), 1, %s788_s19   ;;  %vm557_vm3 = vcmask (!%p199_p9), 261120  }
  0x10   : > { %683 = vmatprep.subr.mxu0 (!%p199_p9), %v798_v1  ;;  %679 = vmatpush3.msk.msra.mxu1 (!%p199_p9), %vm247_vm0, %v240_v2  ;;  %s648_s6 = sshll.u32 (!%p199_p9), %s226_s30, 3  ;;  %v555_v18 = vld [vmem:[%s965_s4] sm:$0xff] (!%p199_p9)  ;;  %s560_s15 = scalar_lea.sflag (!%p199_p9), [#allocation3], %s226_s30 }
  0x11   : > { %680 = vmatprep.mubr.msk.f32.mxu1 (!%p199_p9), %vm799_vm1, %v798_v1  ;;  %688 = vmatprep.subr.mxu1 (!%p199_p9), %v798_v1 }
  0x15   : > { %s230_s9 = scalar_select %p229_p10, %s852_s22, 1 }
  0x17   : > { %s649_s10 = sshll.u32 %s230_s9, 3  ;;  %s662_s9 = sshll.u32 %s852_s22, 7 }
  0x18   : > { %s232_s13 = scalar_lea.vmem %s961_s0, %s649_s10  ;;  %s236_s23 = scalar_lea.vmem %s962_s1, %s649_s10 }
  0x19   : > { %v237_v4 = vld [vmem:[%s232_s13] sm:$0xff]  ;;  %s228_s10 = scalar_lea.vmem [#allocation2], %s648_s6  ;;  %s919_s14 = scalar_lea.hbm %s966_s5, %s662_s9 }
  0x1a   : > { %v238_v5 = vrot.slane %v237_v4, 7  ;;  %v239_v6 = vrot.slane %v237_v4, 1  ;;  %676 = vmatmul.mubr.msk.f32.vlgmr.msra.gmra.mrb[0].mxu0 %vm243_vm2, %v237_v4  ;;  %v476_v8 = vld [vmem:[%s236_s23] sm:$0xff]  ;;  %s573_s11 = sshll.u32 %s228_s10, 4  ;;  %s800_s22 = smov [#allocation2]   ;;  %s921_s11 = int_to_ptr.vmem [resolvable:$true] %s573_s11 }
  0x1b   : > { %684 = vmatpush3.msk.msra.mxu0 %vm247_vm0, %v656_v3  ;;  %685 = vmatprep.mubr.msk.f32.mxu0 %vm799_vm1, %v798_v1  ;;  %s734_s16 = scalar_lea.vmem %s921_s11, 128  ;;  %s738_s17 = sshll.u32 %s800_s22, 4  ;;  %s739_s17 = int_to_ptr.vmem [resolvable:$false] %s738_s17 }
  0x1c   : > { %681 = vmatmul.mubr.msk.f32.vlgmr.msra.gmra.mrb[0].mxu1 %vm243_vm2, %v238_v5  ;;  %p735_p11 = scmp.ne.s32.totalorder %s921_s11, %s734_s16  ;;  %s740_s23 = scalar_lea.vmem %s739_s17, 256 }
  0x1d   : > { %689 = vmatpush3.msk.msra.mxu1 %vm247_vm0, %v477_v7  ;;  %690 = vmatprep.mubr.msk.f32.mxu1 %vm799_vm1, %v798_v1  ;;  %p741_p0 = scmp.lt.s32.totalorder %s921_s11, %s739_s17  ;;  %p742_p1 = scmp.lt.s32.totalorder %s740_s23, %s734_s16 }
  0x1e   : > { %686 = vmatmul.mubr.msk.f32.vlgmr.msra.gmra.mrb[2].mxu0 %vm243_vm2, %v239_v6  ;;  %p736_p12 = pnand %p735_p11, %p869_p5 }
  0x1f   : > { %p743_p2 = por %p742_p1, %p741_p0 }
  0x20   : > { %691 = vmatmul.mubr.msk.f32.vlgmr.msra.gmra.mrb[2].mxu1 %vm243_vm2, %v476_v8  ;;  %p737_p13 = pneg %p736_p12 }
  0x22   : > { %p744_p3 = pnand %p743_p2, %p737_p13 }
  0xed   : > { %v317_v9 = vpop.f32.mrb[0].mxu0 }
  0xee   : > { %v677_v10 = vpop.f32.mrb[1].mxu0 }
  0xef   : > { %v393_v11 = vpop.f32.mrb[0].mxu1 }
  0xf0   : > { %v394_v12 = vadd.f32 %v393_v11, %v317_v9  ;;  %v682_v13 = vpop.f32.mrb[1].mxu1 }
  0xf1   : > { %v471_v14 = vpop.f32.mrb[2].mxu0 }
  0xf2   : > { %v475_v15 = vadd.f32 %v471_v14, %v394_v12  ;;  %v687_v16 = vpop.f32.mrb[3].mxu0 }
  0xf3   : > { %v550_v17 = vpop.f32.mrb[2].mxu1 }
  0xf4   : > { %v554_v19 = vadd.f32 %v550_v17, %v475_v15  ;;  %v692_v20 = vpop.f32.mrb[3].mxu1 }
  0xf6   : > { %v556_v21 = vadd.f32 %v555_v18, %v554_v19 }
  0xf8   : > { %558 = vst.msk [vmem:[%s228_s10] sm:$0xff] %vm557_vm3, %v556_v21 }
  0xf9   : > { %747 = shalt.err (!%p744_p3)
}
  0xfa   : > { %s748_s25 = scalar_lea.hbm %s919_s14, 128  ;;  %s752_s6 = scalar_lea.hbm %s966_s5, 256 }
  0xfb   : > { %p749_p4 = scmp.ne.s32.totalorder %s919_s14, %s748_s25  ;;  %p753_p9 = scmp.lt.u32.totalorder %s919_s14, %s966_s5 }
  0xfc   : > { %p754_p10 = scmp.lt.u32.totalorder %s752_s6, %s748_s25  ;;  %p756_p12 = scmp.lt.u32.totalorder %s748_s25, %s919_s14 }
  0xfd   : > { %p750_p7 = pnand %p749_p4, %p869_p5 }
  0xfe   : > { %p755_p11 = por %p754_p10, %p753_p9 }
  0xff   : > { %p751_p8 = pneg %p750_p7 }
 0x100   : > { %p757_p13 = por %p756_p12, %p755_p11 }
 0x102   : > { %p758_p0 = pnand %p757_p13, %p751_p8 }
 0x104   : > { %761 = shalt.err (!%p758_p0)
}
 0x105   : > { %693 = dma.vmem_to_hbm [thread:$0]  (%p869_p5), %s921_s11, 128, %s919_s14, %s560_s15  }
 0x106 PF: > { %p699_p1 = scmp.ge.s32.totalorder %s796_s21, 2  ;;  %s585_s9 = sand.u32 1, %s784_s18  }
 0x107   : > { %s586_s10 = scalar_lea.sflag [#allocation3], %s585_s9 }
 0x108   : > { %p696_p2 = pnand %p699_p1, %p873_p6 }
 0x10a   : > { %779 = dma.done.wait (!%p696_p2), %s586_s10, 128  }
 0x10b   : > { %781 = vsyncadd (!%p696_p2), %s586_s10, 4294967168  ;;  %p15_p3 = scmp.ge.s32.totalorder %s856_s24, 4   ;;  %s969_s18 = smov %s788_s19 }
 0x10c   : > { %s970_s19 = smov %s792_s20  ;;  %s971_s20 = smov %s867_s27 }
 0x10d   : > { %s972_s21 = smov %s856_s24  ;;  %17 = sbr.rel (!%p15_p3) target bundleno = 3 (0x3), region = 80 }
 0x114   :  { %591 = vsyncpa [#allocation3], 1 }
 0x115   :  { %593 = vsyncpa [#allocation3 + $0x1], 1 }

</bundles_post_ra>
